<compile_context>
chip_gen: v7x
topology: tpu7x:2x2x1
jax: 0.10.0
libtpu: 0.0.40
codegen_flags: <defaults>
</compile_context>

<pallas_src>
import functools
import re

import jax
import jax.numpy as jnp
from jax import lax
from jax.experimental import pallas as pl
from jax.experimental.pallas import tpu as pltpu


def _round_up(x, m):
    return ((x + m - 1) // m) * m


def _tpu_generation():
    """Best-effort TPU generation from device_kind ('TPU v5 lite', 'TPU v6e', ...)."""
    try:
        kind = jax.devices()[0].device_kind.lower()
    except Exception:
        return 0
    m = re.search(r"v(\d+)", kind)
    return int(m.group(1)) if m else 0


def _vmem_params(gen):
    """(VMEM budget for tile sizing, vmem_limit_bytes request) per generation."""
    if 4 <= gen <= 6:            # v4 / v5e / v6e: 128 MiB VMEM per core
        phys = 128 << 20
    elif gen >= 7 or gen == 0:   # v7x: 64 MiB per TensorCore; unknown: be conservative
        phys = 64 << 20
    else:                        # v2 / v3
        phys = 16 << 20
    return int(phys * 0.40), int(phys * 0.75)


def _pick_tile_rows(n_rows, s, itemsize, budget):
    """Largest row tile that fits the VMEM budget.

    Per-row cost:
      * 2x double-buffered logits rows           : 2 * s * itemsize
      * 2x double-buffered lane-padded label rows: 2 * 128 * 4   ((TM,1) pads to 128 lanes)
      * ~6 full-width f32/i32 temporaries Mosaic may materialize for the tile
        (column iota, one-hot mask, f32 upcast, shifted, exp, one-hot select)
    For S >= 128 this lands the logits block in the 2-8 MiB sweet spot, which
    amortizes the ~0.35 us/step grid overhead to near the HBM roofline.
    """
    per_row = 2 * (s * itemsize + 128 * 4) + 6 * s * 4
    tm = max(8, budget // max(per_row, 1))
    tm = min(tm, _round_up(n_rows, 8))
    return int(max(8, (tm // 8) * 8))


def _ce_kernel(logits_ref, labels_ref, out_ref, *, n_rows, upcast_first):
    """Per-tile cross-entropy with ignore_index=-1, emitting per-tile partials.

    logits_ref : (TM, S) VMEM tile of logits (native dtype)
    labels_ref : (TM, 1) int32 VMEM tile of targets
    out_ref    : (1, 2, 128) f32; row 0 = tile loss sum, row 1 = tile valid count
    n_rows     : static total number of real rows N (for tail-tile masking)
    upcast_first: upcast the whole tile to f32 before any math (v5e / unknown gen)
    """
    tm, s = logits_ref.shape
    row0 = pl.program_id(0) * tm

    x = logits_ref[...]                              # (TM, S) native dtype
    labels = labels_ref[...]                         # (TM, 1) int32
    if upcast_first:
        x = x.astype(jnp.float32)

    col = lax.broadcasted_iota(jnp.int32, (tm, s), 1)
    onehot = col == labels                           # (TM, S) bool
    # NOTE: labels outside [-1, S) are silently treated as "no target hit"
    # (loss = log(sum_exp)); torch would raise for them.

    # Row max and target gather straight from the raw logits: one traversal of
    # the slab, and (for bf16 inputs on v6e/v7x) on half-width data.  Both are
    # exact in any dtype: max picks an existing element, the one-hot sum has a
    # single nonzero term.
    m = jnp.max(x, axis=-1, keepdims=True)                           # (TM, 1)
    tgt = jnp.sum(jnp.where(onehot, x, 0), axis=-1, keepdims=True)   # (TM, 1)

    m32 = m.astype(jnp.float32)
    tgt_shift = tgt.astype(jnp.float32) - m32                        # (TM, 1)

    # Only exp needs the full-width slab; the upcast feeds it directly.
    shifted = x.astype(jnp.float32) - m32                            # (TM, S) f32
    sum_exp = jnp.sum(jnp.exp(shifted), axis=-1, keepdims=True)      # (TM, 1)

    # Valid rows: label != -1 and inside the real (unpadded) row range.
    row = row0 + lax.broadcasted_iota(jnp.int32, (tm, 1), 0)
    valid = (labels != -1) & (row < n_rows)

    per_row = jnp.where(valid, jnp.log(sum_exp) - tgt_shift, 0.0)
    tile_sum = jnp.sum(per_row)
    tile_cnt = jnp.sum(valid.astype(jnp.float32))

    # Single lane-dense output block: sublane 0 = sum, sublane 1 = count.
    sel = lax.broadcasted_iota(jnp.int32, (2, 128), 0) == 0
    out_ref[...] = jnp.where(sel, tile_sum, tile_cnt).astype(jnp.float32).reshape(1, 2, 128)


@functools.partial(jax.jit, static_argnames=("tile_rows",))
def super_attn_loss(stacked_alpha, attn_labels, *, tile_rows=None):
    """stacked_alpha: (B, H, T, S) float; attn_labels: (B, T, H) int in [-1, S)."""
    B, H, T, S = stacked_alpha.shape
    N = B * H * T

    # attn_labels.transpose_(1, 2): (B, T, H) -> (B, H, T), then flatten.
    # TODO(synk): lane-dense (n_tiles, TM) label layout would drop the 512 B/row
    # lane padding of the (TM, 1) block; needs an in-kernel lane->sublane relayout.
    labels = jnp.transpose(attn_labels, (0, 2, 1)).reshape(N, 1).astype(jnp.int32)
    # Logits stay in their native dtype through the BlockSpec (no padding copy,
    # no wrapper-side f32 cast of the big slab).
    logits = stacked_alpha.reshape(N, S)

    gen = _tpu_generation()
    budget, vmem_limit = _vmem_params(gen)
    # bf16 VPU path on v6e/v7x (exp/log/accumulation stay in f32); f32-first on
    # v5e (no bf16 VALU) and on unknown generations.
    upcast_first = (logits.dtype != jnp.float32) and not (gen >= 6)

    if tile_rows is None:
        tm = _pick_tile_rows(N, S, logits.dtype.itemsize, budget)
        n_tiles = pl.cdiv(N, tm)
        # Megacore (v7x has 2 TensorCores): keep >= 2 parallel tiles whenever
        # the problem allows, and balance them.
        if n_tiles < 2 and N > 8:
            n_tiles = 2
        tm_bal = max(8, _round_up(pl.cdiv(N, n_tiles), 8))
        if tm_bal <= tm:
            tm = tm_bal
        n_tiles = pl.cdiv(N, tm)
    else:
        tm = max(8, (int(tile_rows) // 8) * 8)
        n_tiles = pl.cdiv(N, tm)

    kernel = functools.partial(_ce_kernel, n_rows=N, upcast_first=upcast_first)

    # TODO(synk): for very large S (tens of thousands) add a second "arbitrary"
    # grid axis over S-chunks with online-softmax (m, l, tgt) scratch
    # accumulators finalized under pl.when on the last chunk.
    partials = pl.pallas_call(
        kernel,
        out_shape=jax.ShapeDtypeStruct((n_tiles, 2, 128), jnp.float32),
        grid_spec=pltpu.PrefetchScalarGridSpec(
            num_scalar_prefetch=0,
            grid=(n_tiles,),
            in_specs=[
                pl.BlockSpec((tm, S), lambda i: (i, 0)),
                pl.BlockSpec((tm, 1), lambda i: (i, 0)),
            ],
            out_specs=pl.BlockSpec((1, 2, 128), lambda i: (i, 0, 0)),
        ),
        compiler_params=pltpu.CompilerParams(
            dimension_semantics=("parallel",),
            vmem_limit_bytes=vmem_limit,
        ),
        cost_estimate=pl.CostEstimate(
            flops=8 * N * S,
            transcendentals=N * S,
            bytes_accessed=N * S * logits.dtype.itemsize + N * 4 + n_tiles * 1024,
        ),
    )(logits, labels)

    loss_sum = jnp.sum(partials[:, 0, 0])
    count = jnp.sum(partials[:, 1, 0])
    # NOTE: returns 0.0 if every label is -1; torch CrossEntropyLoss would
    # return NaN (0/0) in that degenerate case.
    return loss_sum / jnp.maximum(count, 1.0)


def super_attn_forward(stacked_alpha, attn_labels):
    loss = super_attn_loss(stacked_alpha, attn_labels)
    # Return the jnp scalar (no .item()/float() device sync) so this stays
    # jit/grad friendly.
    return loss, {"CrossEntropy Loss": loss}


def _reference_loss(stacked_alpha, attn_labels):
    """Pure-JAX reference (CrossEntropyLoss, ignore_index=-1, mean reduction)."""
    B, H, T, S = stacked_alpha.shape
    labels = jnp.transpose(attn_labels, (0, 2, 1)).reshape(-1)
    logits = stacked_alpha.reshape(-1, S).astype(jnp.float32)
    logp = jax.nn.log_softmax(logits, axis=-1)
    safe = jnp.where(labels == -1, 0, labels)
    nll = -jnp.take_along_axis(logp, safe[:, None], axis=-1)[:, 0]
    valid = (labels != -1).astype(jnp.float32)
    return jnp.sum(nll * valid) / jnp.maximum(jnp.sum(valid), 1.0)


if __name__ == "__main__":
    key = jax.random.PRNGKey(0)

    # --- Test 1: baseline shapes, float32, auto tile size (>=2 parallel tiles)
    B, H, T, S = 2, 4, 8, 16
    k1, k2, k3, k4 = jax.random.split(key, 4)
    stacked_alpha = jax.random.normal(k1, (B, H, T, S), dtype=jnp.float32)
    attn_labels = jax.random.randint(k2, (B, T, H), minval=-1, maxval=S,
                                     dtype=jnp.int32)

    loss, info = super_attn_forward(stacked_alpha, attn_labels)
    loss = jax.block_until_ready(loss)
    ref = jax.block_until_ready(_reference_loss(stacked_alpha, attn_labels))
    assert abs(float(loss) - float(ref)) < 1e-4, (float(loss), float(ref))

    # --- Test 2: bf16 logits (native bf16 max/select path on v6e/v7x) --------
    sa_bf16 = stacked_alpha.astype(jnp.bfloat16)
    loss_bf = jax.block_until_ready(super_attn_loss(sa_bf16, attn_labels))
    ref_bf = jax.block_until_ready(_reference_loss(sa_bf16, attn_labels))
    assert abs(float(loss_bf) - float(ref_bf)) < 5e-4, (float(loss_bf), float(ref_bf))

    # --- Test 3: ragged N (not a multiple of 8) -> in-kernel tail masking ----
    B2, H2, T2, S2 = 2, 3, 7, 20
    sa2 = jax.random.normal(k3, (B2, H2, T2, S2), dtype=jnp.float32)
    lb2 = jax.random.randint(k4, (B2, T2, H2), minval=-1, maxval=S2,
                             dtype=jnp.int32)
    loss2 = jax.block_until_ready(super_attn_loss(sa2, lb2))
    ref2 = jax.block_until_ready(_reference_loss(sa2, lb2))
    assert abs(float(loss2) - float(ref2)) < 1e-4, (float(loss2), float(ref2))

    # --- Test 4: forced small tile -> multiple grid steps + padded tail ------
    loss3 = jax.block_until_ready(
        super_attn_loss(stacked_alpha, attn_labels, tile_rows=24))
    assert abs(float(loss3) - float(ref)) < 1e-4, (float(loss3), float(ref))

    print("KERNEL_OK")
</pallas_src>

<mosaic_0001>
module attributes {stable_mosaic.version = 11 : i64} {
  func.func @_ce_kernel(%arg0: i32, %arg1: memref<32x16xf32, #tpu.memory_space<vmem>>, %arg2: memref<32x1xi32, #tpu.memory_space<vmem>>, %arg3: memref<1x2x128xf32, #tpu.memory_space<vmem>>) attributes {dimension_semantics = [#tpu.dimension_semantics<parallel>], iteration_bounds = array<i64: 2>, scalar_prefetch = 0 : i64, scratch_operands = 0 : i64, tpu.core_type = #tpu.core_type<tc>, window_params = [{transform_indices = @transform_0, window_bounds = array<i64: 32, 16>}, {transform_indices = @transform_1, window_bounds = array<i64: 32, 1>}, {transform_indices = @transform_2, window_bounds = array<i64: 1, 2, 128>}]} {
    %c32_i32 = arith.constant 32 : i32
    %0 = arith.muli %arg0, %c32_i32 : i32
    %c0 = arith.constant 0 : index
    %c0_0 = arith.constant 0 : index
    %1 = vector.load %arg1[%c0, %c0_0] : memref<32x16xf32, #tpu.memory_space<vmem>>, vector<32x16xf32>
    %c0_1 = arith.constant 0 : index
    %c0_2 = arith.constant 0 : index
    %2 = vector.load %arg2[%c0_1, %c0_2] : memref<32x1xi32, #tpu.memory_space<vmem>>, vector<32x1xi32>
    %3 = tpu.iota {dimensions = array<i32: 1>} : vector<32x16xi32>
    %4 = vector.broadcast %2 : vector<32x1xi32> to vector<32x16xi32>
    %5 = arith.cmpi eq, %3, %4 : vector<32x16xi32>
    %cst = arith.constant dense<0xFF800000> : vector<32xf32>
    %6 = vector.multi_reduction <maximumf>, %1, %cst [1] : vector<32x16xf32> to vector<32xf32>
    %7 = vector.shape_cast %6 : vector<32xf32> to vector<32x1xf32>
    %c0_i32 = arith.constant 0 : i32
    %8 = arith.sitofp %c0_i32 : i32 to f32
    %9 = vector.broadcast %8 : f32 to vector<32x16xf32>
    %10 = arith.select %5, %1, %9 : vector<32x16xi1>, vector<32x16xf32>
    %cst_3 = arith.constant dense<0.000000e+00> : vector<32xf32>
    %11 = vector.multi_reduction <add>, %10, %cst_3 [1] : vector<32x16xf32> to vector<32xf32>
    %12 = vector.shape_cast %11 : vector<32xf32> to vector<32x1xf32>
    %13 = arith.subf %12, %7 : vector<32x1xf32>
    %14 = vector.broadcast %7 : vector<32x1xf32> to vector<32x16xf32>
    %15 = arith.subf %1, %14 : vector<32x16xf32>
    %16 = math.exp %15 : vector<32x16xf32>
    %cst_4 = arith.constant dense<0.000000e+00> : vector<32xf32>
    %17 = vector.multi_reduction <add>, %16, %cst_4 [1] : vector<32x16xf32> to vector<32xf32>
    %18 = vector.shape_cast %17 : vector<32xf32> to vector<32x1xf32>
    %19 = tpu.iota {dimensions = array<i32: 0>} : vector<32x1xi32>
    %20 = vector.broadcast %0 : i32 to vector<32x1xi32>
    %21 = arith.addi %20, %19 : vector<32x1xi32>
    %c-1_i32 = arith.constant -1 : i32
    %22 = vector.broadcast %c-1_i32 : i32 to vector<32x1xi32>
    %23 = arith.cmpi ne, %2, %22 : vector<32x1xi32>
    %c64_i32 = arith.constant 64 : i32
    %24 = vector.broadcast %c64_i32 : i32 to vector<32x1xi32>
    %25 = arith.cmpi slt, %21, %24 : vector<32x1xi32>
    %26 = arith.andi %23, %25 : vector<32x1xi1>
    %27 = math.log %18 : vector<32x1xf32>
    %28 = arith.subf %27, %13 : vector<32x1xf32>
    %cst_5 = arith.constant 0.000000e+00 : f32
    %29 = vector.broadcast %cst_5 : f32 to vector<32x1xf32>
    %30 = arith.select %26, %28, %29 : vector<32x1xi1>, vector<32x1xf32>
    %31 = vector.shape_cast %30 : vector<32x1xf32> to vector<1x32x1xf32>
    %cst_6 = arith.constant dense<0.000000e+00> : vector<1xf32>
    %32 = vector.multi_reduction <add>, %31, %cst_6 [1, 2] : vector<1x32x1xf32> to vector<1xf32>
    %33 = vector.shape_cast %32 : vector<1xf32> to vector<1x1x1xf32>
    %34 = vector.extract %33[0, 0, 0] : f32 from vector<1x1x1xf32>
    %35 = arith.extui %26 : vector<32x1xi1> to vector<32x1xi32>
    %36 = arith.sitofp %35 : vector<32x1xi32> to vector<32x1xf32>
    %37 = vector.shape_cast %36 : vector<32x1xf32> to vector<1x32x1xf32>
    %cst_7 = arith.constant dense<0.000000e+00> : vector<1xf32>
    %38 = vector.multi_reduction <add>, %37, %cst_7 [1, 2] : vector<1x32x1xf32> to vector<1xf32>
    %39 = vector.shape_cast %38 : vector<1xf32> to vector<1x1x1xf32>
    %40 = vector.extract %39[0, 0, 0] : f32 from vector<1x1x1xf32>
    %41 = tpu.iota {dimensions = array<i32: 0>} : vector<2x128xi32>
    %c0_i32_8 = arith.constant 0 : i32
    %42 = vector.broadcast %c0_i32_8 : i32 to vector<2x128xi32>
    %43 = arith.cmpi eq, %41, %42 : vector<2x128xi32>
    %44 = vector.broadcast %34 : f32 to vector<2x128xf32>
    %45 = vector.broadcast %40 : f32 to vector<2x128xf32>
    %46 = arith.select %43, %44, %45 : vector<2x128xi1>, vector<2x128xf32>
    %47 = vector.shape_cast %46 : vector<2x128xf32> to vector<1x2x128xf32>
    %c0_9 = arith.constant 0 : index
    %c0_10 = arith.constant 0 : index
    %c0_11 = arith.constant 0 : index
    %48 = vector.load %arg3[%c0_9, %c0_10, %c0_11] : memref<1x2x128xf32, #tpu.memory_space<vmem>>, vector<1x2x128xf32>
    tpu.vector_store %arg3[%c0_9, %c0_10, %c0_11], %47 {strides = array<i32>} : memref<1x2x128xf32, #tpu.memory_space<vmem>>, vector<1x2x128xf32>,
    return
  }
  func.func @transform_0(%arg0: i32) -> (i32, i32) {
    %c0_i32 = arith.constant 0 : i32
    %c0_i32_0 = arith.constant 0 : i32
    return %arg0, %c0_i32 : i32, i32
  }
  func.func @transform_1(%arg0: i32) -> (i32, i32) {
    %c0_i32 = arith.constant 0 : i32
    %c0_i32_0 = arith.constant 0 : i32
    return %arg0, %c0_i32 : i32, i32
  }
  func.func @transform_2(%arg0: i32) -> (i32, i32, i32) {
    %c0_i32 = arith.constant 0 : i32
    %c0_i32_0 = arith.constant 0 : i32
    %c0_i32_1 = arith.constant 0 : i32
    return %arg0, %c0_i32, %c0_i32_0 : i32, i32, i32
  }
}

</mosaic_0001>

<bundles_post_ra>
// kernel: super_attn_loss.1
= control target key start
LH: loop header
LB: loop body
LE: loop exit
PB: predicated region body
PF: predicated region fallthrough
CT: control target
= control target key end

     0   :  { %s473_s9 = smov 0   ;;  %s600_s0 = inlined_call_operand.vmem [shape: f32[64,16], index: 0, kind: input, shape index: {}]   ;;  %s601_s1 = inlined_call_operand.vmem [shape: s32[64,1], index: 1, kind: input, shape index: {}]   ;;  %s602_s2 = inlined_call_operand.vmem [shape: f32[2,2,128], index: 2, kind: output, shape index: {}]  }
   0x1 LB: > { %s479_s10 = sadd.s32 4294967295, %s454_s9   ;;  %p403_p0 = scmp.ge.s32.totalorder %s454_s9, 1  ;;  %s454_s9 = sphi %s473_s9, %s12_s9  }
   0x2   : > { %p124_p1 = scmp.lt.s32.totalorder %s454_s9, 3 }
   0x4   : > { %p125_p2 = pnand %p403_p0, %p124_p1 }
   0x5   : > { %s404_s11 = sshll.u32 (!%p125_p2), %s479_s10, 2  ;;  %v456_v0 = vmov (!%p125_p2), 0   ;;  %vm193_vm0 = vcmask (!%p125_p2), 130048   ;;  %v175_v25 = vlaneseq (!%p125_p2)  ;;  %s409_s19 = sshll.u32 (!%p125_p2), %s479_s10, 5  ;;  %vm288_vm13 = vcmask (!%p125_p2), 7168  }
   0x6   : > { %128 = sbr.rel (%p125_p2) target bundleno = 554 (0x22a), region = 28  ;;  %p151_p3 = scmp.lt.s32.totalorder (!%p125_p2), %s404_s11, 7  ;;  %431 = vset.pattern.permute.xlu1 (!%p125_p2), %v456_v0  ;;  %430 = vset.pattern.permute.xlu0 (!%p125_p2), %v456_v0  ;;  %v255_v44 = vstv (!%p125_p2), %s409_s19  ;;  %v457_v58 = vmov (!%p125_p2), 0.0  }
   0x7   : > { %v176_v27 = vand.u32 (!%p125_p2), 127, %v175_v25  ;;  %v529_v38 = vshrl.u32 (!%p125_p2), %v175_v25, 7  ;;  %p162_p4 = scmp.lt.s32.totalorder (!%p125_p2), %s479_s10, 1 }
   0x9   : > { %v252_v42 = vadd.s32 (!%p125_p2), 8, %v529_v38  ;;  %v253_v48 = vadd.s32 (!%p125_p2), 16, %v529_v38  ;;  %v256_v49 = vadd.s32 (!%p125_p2), %v255_v44, %v529_v38  ;;  %v254_v53 = vadd.s32 (!%p125_p2), 24, %v529_v38 }
   0xb   : > { %v257_v47 = vadd.s32 (!%p125_p2), %v255_v44, %v252_v42  ;;  %v258_v52 = vadd.s32 (!%p125_p2), %v255_v44, %v253_v48  ;;  %vm264_vm8 = vcmp.lt.s32.totalorder (!%p125_p2), %v256_v49, 64  ;;  %v259_v57 = vadd.s32 (!%p125_p2), %v255_v44, %v254_v53 }
   0xd   : > { %s612_s11 = smov (!%p151_p3, %s404_s11), 7  ;;  %vm265_vm6 = vcmp.lt.s32.totalorder %v257_v47, 64  ;;  %vm266_vm12 = vcmp.lt.s32.totalorder %v258_v52, 64  ;;  %s614_s10 = smov (!%p162_p4, %s479_s10), 1 }
   0xe   : > { %s405_s12 = sshll.u32 %s612_s11, 3  ;;  %s408_s20 = sshll.u32 %s614_s10, 1 }
   0xf   : > { %s154_s15 = scalar_lea.vmem %s600_s0, %s405_s12  ;;  %s160_s18 = scalar_lea.vmem %s601_s1, %s405_s12 }
  0x10   : > { %v167_v1 = vld [vmem:[%s154_s15] sm:$0xff]  ;;  %v169_v2 = vld [vmem:[%s154_s15 + $0x10] sm:$0xff]  ;;  %v487_v3 = vld [vmem:[%s154_s15 + $0x8] sm:$0xff]  ;;  %s165_s24 = scalar_lea.vmem %s602_s2, %s408_s20 }
  0x11   : > { %v194_v4 = vsel %vm193_vm0, %v167_v1, -inf  ;;  %v200_v5 = vsel %vm193_vm0, %v169_v2, -inf  ;;  %v491_v6 = vld [vmem:[%s154_s15 + $0x18] sm:$0xff]  ;;  %v197_v7 = vsel %vm193_vm0, %v487_v3, -inf  ;;  %v500_v9 = vld [vmem:[%s160_s18 + $0x8] sm:$0xff]  ;;  %v503_v10 = vld [vmem:[%s160_s18 + $0x10] sm:$0xff] }
  0x12   : > { %195 = vmax.xlane.f32.xlu0 %v194_v4  ;;  %201 = vmax.xlane.f32.xlu1 %v200_v5  ;;  %v203_v8 = vsel %vm193_vm0, %v491_v6, -inf  ;;  %v505_v11 = vld [vmem:[%s160_s18] sm:$0xff]  ;;  %v508_v12 = vld [vmem:[%s160_s18 + $0x18] sm:$0xff]  ;;  %vm261_vm5 = vcmp.ne.s32.totalorder %v500_v9, 4294967295  ;;  %vm262_vm11 = vcmp.ne.s32.totalorder %v503_v10, 4294967295 }
  0x13   : > { %vm260_vm7 = vcmp.ne.s32.totalorder %v505_v11, 4294967295  ;;  %vm545_vm9 = vmand %vm261_vm5, %vm265_vm6  ;;  %vm263_vm15 = vcmp.ne.s32.totalorder %v508_v12, 4294967295 }
  0x14   : > { %vm549_vm10 = vmand %vm260_vm7, %vm264_vm8  ;;  %v411_v59 = vsel %vm545_vm9, 1.0, %v457_v58 }
  0x15   : > { %v410_v60 = vsel %vm549_vm10, 1.0, %v457_v58  ;;  %vm558_vm14 = vmand %vm262_vm11, %vm266_vm12  ;;  %v314_v62 = vsel %vm288_vm13, %v411_v59, 0.0 }
  0x16   : > { %198 = vmax.xlane.f32.xlu0 %v197_v7  ;;  %204 = vmax.xlane.f32.xlu1 %v203_v8  ;;  %v313_v63 = vsel %vm288_vm13, %v410_v60, 0.0  ;;  %v412_v0 = vsel %vm558_vm14, 1.0, %v457_v58 }
  0x27   : > { %181 = vperm.xlu1 %431, %v500_v9  }
  0x2b   : > { %184 = vperm.xlu1 %431, %v503_v10  }
  0x2c   : > { %178 = vperm.xlu0 %430, %v505_v11  }
  0x2f   : > { %187 = vperm.xlu1 %431, %v508_v12  }
  0x9f   : > { %v512_v13 = vpop.xlane.xlu0 %195  ;;  %v514_v14 = vpop.xlane.xlu1 %201 }
  0xa0   : > { %v226_v15 = vsub.f32 %v167_v1, %v512_v13  ;;  %v228_v16 = vsub.f32 %v169_v2, %v514_v14 }
  0xa2   : > { %v230_v17 = vmul.f32 1.442695, %v226_v15  ;;  %v234_v18 = vmul.f32 1.442695, %v228_v16 }
  0xa3   : > { %v518_v19 = vpop.xlane.xlu0 %198  ;;  %v520_v20 = vpop.xlane.xlu1 %204 }
  0xa4   : > { %432 = vpow2.f32 %v230_v17  ;;  %v227_v21 = vsub.f32 %v487_v3, %v518_v19  ;;  %v229_v22 = vsub.f32 %v491_v6, %v520_v20 }
  0xa5   : > { %434 = vpow2.f32 %v234_v18 }
  0xa6   : > { %v232_v23 = vmul.f32 1.442695, %v227_v21  ;;  %v236_v24 = vmul.f32 1.442695, %v229_v22 }
  0xa7   : > { %v182_v26 = vpop.permute.xlu1 %181 }
  0xa8   : > { %436 = vpow2.f32 %v232_v23  ;;  %vm190_vm3 = vcmp.eq.s32.totalorder %v176_v27, %v182_v26 }
  0xa9   : > { %438 = vpow2.f32 %v236_v24  ;;  %v207_v46 = vsel %vm190_vm3, %v487_v3, 0.0  ;;  %v316_v3 = vsel %vm288_vm13, %v412_v0, 0.0 }
  0xaa   : > { %v213_v50 = vsel %vm193_vm0, %v207_v46, 0.0 }
  0xab   : > { %v185_v28 = vpop.permute.xlu1 %184  ;;  %v179_v32 = vpop.permute.xlu0 %178 }
  0xac   : > { %vm191_vm1 = vcmp.eq.s32.totalorder %v176_v27, %v185_v28  ;;  %vm189_vm2 = vcmp.eq.s32.totalorder %v176_v27, %v179_v32 }
  0xad   : > { %v208_v35 = vsel %vm191_vm1, %v169_v2, 0.0  ;;  %v206_v41 = vsel %vm189_vm2, %v167_v1, 0.0  ;;  %v315_v2 = vadd.f32 %v314_v62, %v313_v63  ;;  %vm329_vm2 = vcmp.eq.s32.totalorder %v529_v38, 0 }
  0xae   : > { %v433_v29 = vpop.eup %432  ;;  %v216_v40 = vsel %vm193_vm0, %v208_v35, 0.0  ;;  %v210_v43 = vsel %vm193_vm0, %v206_v41, 0.0 }
  0xaf   : > { %v435_v30 = vpop.eup %434  ;;  %v238_v31 = vsel %vm193_vm0, %v433_v29, 0.0  ;;  %v188_v45 = vpop.permute.xlu1 %187  ;;  %v317_v5 = vadd.f32 %v316_v3, %v315_v2 }
  0xb0   : > { %239 = vadd.xlane.f32.xlu1 %v238_v31  ;;  %v244_v33 = vsel %vm193_vm0, %v435_v30, 0.0  ;;  %vm192_vm4 = vcmp.eq.s32.totalorder %v176_v27, %v188_v45 }
  0xb1   : > { %v209_v51 = vsel %vm192_vm4, %v491_v6, 0.0 }
  0xb2   : > { %v437_v34 = vpop.eup %436  ;;  %v219_v54 = vsel %vm193_vm0, %v209_v51, 0.0 }
  0xb3   : > { %v439_v36 = vpop.eup %438  ;;  %v241_v37 = vsel %vm193_vm0, %v437_v34, 0.0 }
  0xb4   : > { %245 = vadd.xlane.f32.xlu1 %v244_v33  ;;  %242 = vadd.xlane.f32.xlu0 %v241_v37  ;;  %v247_v39 = vsel %vm193_vm0, %v439_v36, 0.0  ;;  %vm267_vm0 = vcmp.lt.s32.totalorder %v259_v57, 64 }
  0xb5   : > { %vm567_vm1 = vmand %vm263_vm15, %vm267_vm0 }
  0xb6   : > { %v413_v4 = vsel %vm567_vm1, 1.0, %v457_v58 }
  0xb7   : > { %v318_v6 = vsel %vm288_vm13, %v413_v4, 0.0 }
  0xb8   : > { %248 = vadd.xlane.f32.xlu1 %v247_v39  ;;  %217 = vadd.xlane.f32.xlu0 %v216_v40  ;;  %v319_v7 = vadd.f32 %v318_v6, %v317_v5 }
  0xbc   : > { %211 = vadd.xlane.f32.xlu1 %v210_v43 }
  0xc0   : > { %214 = vadd.xlane.f32.xlu1 %v213_v50 }
  0xc4   : > { %220 = vadd.xlane.f32.xlu1 %v219_v54 }
  0xc8   : > { %320 = vadd.xlane.f32.xlu1 %v319_v7 }
 0x13d   : > { %v240_v8 = vpop.xlane.xlu1 %239 }
 0x13e   : > { %440 = vlog2.f32 %v240_v8 }
 0x141   : > { %v246_v9 = vpop.xlane.xlu1 %245  ;;  %v243_v10 = vpop.xlane.xlu0 %242 }
 0x142   : > { %442 = vlog2.f32 %v246_v9 }
 0x143   : > { %444 = vlog2.f32 %v243_v10 }
 0x145   : > { %v249_v11 = vpop.xlane.xlu1 %248  ;;  %v218_v17 = vpop.xlane.xlu0 %217 }
 0x146   : > { %446 = vlog2.f32 %v249_v11  ;;  %v224_v25 = vsub.f32 %v218_v17, %v514_v14 }
 0x148   : > { %v441_v12 = vpop.eup %440 }
 0x149   : > { %v273_v15 = vmul.f32 0.6931472, %v441_v12  ;;  %v212_v16 = vpop.xlane.xlu1 %211 }
 0x14a   : > { %v222_v18 = vsub.f32 %v212_v16, %v512_v13 }
 0x14c   : > { %v443_v21 = vpop.eup %442  ;;  %v280_v22 = vsub.f32 %v273_v15, %v222_v18 }
 0x14d   : > { %v445_v23 = vpop.eup %444  ;;  %v277_v24 = vmul.f32 0.6931472, %v443_v21  ;;  %v215_v26 = vpop.xlane.xlu1 %214 }
 0x14e   : > { %v275_v27 = vmul.f32 0.6931472, %v445_v23  ;;  %v223_v28 = vsub.f32 %v215_v26, %v518_v19  ;;  %v284_v31 = vsel %vm549_vm10, %v280_v22, 0.0 }
 0x14f   : > { %v282_v29 = vsub.f32 %v277_v24, %v224_v25  ;;  %v289_v36 = vsel %vm288_vm13, %v284_v31, 0.0 }
 0x150   : > { %v447_v30 = vpop.eup %446  ;;  %v281_v32 = vsub.f32 %v275_v27, %v223_v28 }
 0x151   : > { %v279_v33 = vmul.f32 0.6931472, %v447_v30  ;;  %v221_v34 = vpop.xlane.xlu1 %220  ;;  %v286_v13 = vsel %vm558_vm14, %v282_v29, 0.0 }
 0x152   : > { %v285_v35 = vsel %vm545_vm9, %v281_v32, 0.0  ;;  %v225_v14 = vsub.f32 %v221_v34, %v520_v20  ;;  %v292_v40 = vsel %vm288_vm13, %v286_v13, 0.0 }
 0x153   : > { %v290_v19 = vsel %vm288_vm13, %v285_v35, 0.0 }
 0x154   : > { %v283_v37 = vsub.f32 %v279_v33, %v225_v14  ;;  %v291_v39 = vadd.f32 %v290_v19, %v289_v36 }
 0x155   : > { %v321_v45 = vpop.xlane.xlu1 %320 }
 0x156   : > { %v287_v41 = vsel %vm567_vm1, %v283_v37, 0.0  ;;  %v293_v42 = vadd.f32 %v292_v40, %v291_v39  ;;  %v322_v46 = vrot.slane %v321_v45, 4 }
 0x157   : > { %v294_v43 = vsel %vm288_vm13, %v287_v41, 0.0 }
 0x158   : > { %v295_v44 = vadd.f32 %v294_v43, %v293_v42  ;;  %v323_v20 = vadd.f32 %v322_v46, %v321_v45 }
 0x15a   : > { %296 = vadd.xlane.f32.xlu0 %v295_v44  ;;  %v324_v47 = vrot.slane %v323_v20, 2 }
 0x15c   : > { %v325_v51 = vadd.f32 %v324_v47, %v323_v20 }
 0x15e   : > { %v326_v54 = vrot.slane %v325_v51, 1 }
 0x160   : > { %v327_v57 = vadd.f32 %v326_v54, %v325_v51 }
 0x1e7   : > { %v297_v48 = vpop.xlane.xlu0 %296 }
 0x1e8   : > { %v298_v49 = vrot.slane %v297_v48, 4 }
 0x1ea   : > { %v299_v50 = vadd.f32 %v298_v49, %v297_v48 }
 0x1ec   : > { %v300_v52 = vrot.slane %v299_v50, 2 }
 0x1ee   : > { %v301_v53 = vadd.f32 %v300_v52, %v299_v50 }
 0x1f0   : > { %v302_v55 = vrot.slane %v301_v53, 1 }
 0x1f2   : > { %v303_v56 = vadd.f32 %v302_v55, %v301_v53 }
 0x1f4   : > { %416 = vpush %v303_v56 }
 0x1f5   : > { %418 = vpush %v327_v57 }
 0x225   : > { %s417_s21 = spop %416 }
 0x226   : > { %v330_v58 = vstv %s417_s21  ;;  %s419_s25 = spop %418 }
 0x227   : > { %v331_v59 = vstv %s419_s25 }
 0x228   : > { %v332_v60 = vsel %vm329_vm2, %v330_v58, %v331_v59 }
 0x229   : > { %333 = vst [vmem:[%s165_s24] sm:$0x3] %v332_v60 }
 0x22a PF: > { %s12_s9 = sadd.s32 1, %s454_s9  }
 0x22b   : > { %p9_p5 = scmp.ge.s32.totalorder %s12_s9, 4  }
 0x22d   :  { %11 = sbr.rel (!%p9_p5) target bundleno = 1 (0x1), region = 61 }

</bundles_post_ra>
